<compile_context>
chip_gen: v7x
topology: tpu7x:2x2x1
jax: 0.10.0
libtpu: 0.0.40
codegen_flags: <defaults>
</compile_context>

<pallas_src>
import functools

import jax
import jax.numpy as jnp
from jax.experimental import pallas as pl
from jax.experimental.pallas import tpu as pltpu


def _fcnn_kernel(x_ref, w1_ref, b1_ref, w2_ref, b2_ref, w3_ref, b3_ref,
                 preds_ref, mask_ref, out_ref):
    f32 = jnp.float32

    # ---- fcnn: Linear -> ReLU -> Linear -> ReLU -> Linear (batch on sublanes) ----
    h1 = jnp.dot(x_ref[...], w1_ref[...], preferred_element_type=f32) + b1_ref[...]
    h1 = jnp.maximum(h1, 0.0)
    h2 = jnp.dot(h1, w2_ref[...], preferred_element_type=f32) + b2_ref[...]
    h2 = jnp.maximum(h2, 0.0)
    logits = jnp.dot(h2, w3_ref[...], preferred_element_type=f32) + b3_ref[...]  # (TILE_B, F)

    # Move the tiny forecaster axis onto sublanes so the batch axis sits on the
    # 128-lane axis for the softmax reductions and the lane-dense output store.
    # (Small XLU relayout; hidden under the mem-bound regime per the perf review.)
    logits_t = logits.T                                    # (F, TILE_B)

    preds_t = preds_ref[...]                               # (F, TILE_B), already lane-dense
    mask_t = mask_ref[...]                                 # (F, TILE_B)

    # ---- masked softmax over the forecaster (sublane) axis ----------------------
    # TODO(synk): masked_softmax source is not in the spec snippet; assuming mask==1
    # means "prediction present / keep", excluded positions get zero weight, and an
    # all-masked row yields all-zero weights (standard guarded implementation).
    keep_bool = mask_t > 0.5
    keep = keep_bool.astype(f32)
    masked = jnp.where(keep_bool, logits_t, jnp.float32(-1e30))
    col_max = jnp.max(masked, axis=0, keepdims=True)       # (1, TILE_B)
    exps = jnp.exp(masked - col_max) * keep                # (F, TILE_B)
    denom = jnp.sum(exps, axis=0, keepdims=True)           # (1, TILE_B)
    denom = jnp.where(denom == 0.0, f32(1.0), denom)       # guard all-masked rows
    weights = exps * pl.reciprocal(denom, approx=True)     # (F, TILE_B)

    # ---- weighted sum of forecaster predictions -> lane-dense (1, TILE_B) row ----
    out_ref[...] = jnp.sum(preds_t * weights, axis=0, keepdims=True)


def init_fcnn_params(key, forecasters_num=6, n_inputs=(11, 32, 64), series_len=21):
    """Deterministic synthetic parameters with the same shapes as the torch module."""
    dims = [n_inputs[0] * series_len, n_inputs[1], n_inputs[2], forecasters_num]
    params = {}
    for i, (d_in, d_out) in enumerate(zip(dims[:-1], dims[1:])):
        key, kw, kb = jax.random.split(key, 3)
        scale = 1.0 / jnp.sqrt(jnp.float32(d_in))
        params[f"w{i+1}"] = jax.random.uniform(
            kw, (d_in, d_out), jnp.float32, -scale, scale)
        params[f"b{i+1}"] = jax.random.uniform(
            kb, (1, d_out), jnp.float32, -scale, scale)
    return params


def _tile_b_cap():
    # >=2048 rows/tile everywhere (amortizes the ~0.35us per-step cost);
    # 4096 on v6e/v7x where faster HBM makes the fixed step overhead dominate
    # smaller tiles.  v5e stays at 2048 (its slower HBM is already amortized).
    try:
        kind = jax.devices()[0].device_kind.lower()
    except Exception:
        return 2048
    return 2048 if "v5" in kind else 4096


def _choose_tile_b(batch):
    cap = _tile_b_cap()
    t = 128                      # minimum lane-aligned output tile
    while t < batch and t < cap:
        t *= 2
    return t


def fcnn_forward(batch, params, forecasters_num=6, use_bf16_inputs=False):
    x, preds_to_ensemble = batch
    B = x.shape[0]
    F = forecasters_num

    in_dtype = jnp.bfloat16 if use_bf16_inputs else jnp.float32
    x_flat = x.reshape(B, -1).astype(in_dtype)              # torch.flatten(x, 1)
    pe = preds_to_ensemble.astype(jnp.float32)              # (B, 2F)
    d_in = x_flat.shape[1]

    w1 = params["w1"].astype(in_dtype)
    w2 = params["w2"].astype(in_dtype)
    w3 = params["w3"].astype(in_dtype)
    b1, b2, b3 = params["b1"], params["b2"], params["b3"]   # biases / tail stay f32

    tile_b = _choose_tile_b(B)
    num_tiles = pl.cdiv(B, tile_b)
    b_pad = num_tiles * tile_b

    # Lane-dense (F, B) layouts for the softmax tail.  Only these tiny arrays are
    # padded (zero mask -> zero weight -> zero output for padded columns); x itself
    # is left unpadded and the ragged last grid tile is handled by Pallas' clamped
    # DMA -- garbage rows are masked out, so no full-HBM jnp.pad copy of x.
    pad = b_pad - B
    preds_t = jnp.pad(pe[:, :F].T, ((0, 0), (0, pad)))      # (F, b_pad)
    mask_t = jnp.pad(pe[:, F:].T, ((0, 0), (0, pad)))       # (F, b_pad)

    out = pl.pallas_call(
        _fcnn_kernel,
        out_shape=jax.ShapeDtypeStruct((1, b_pad), jnp.float32),
        grid_spec=pltpu.PrefetchScalarGridSpec(
            num_scalar_prefetch=0,
            grid=(num_tiles,),
            in_specs=[
                pl.BlockSpec((tile_b, d_in), lambda i: (i, 0)),        # x tile (ragged tail OK)
                pl.BlockSpec(w1.shape, lambda i: (0, 0)),              # VMEM-resident weights
                pl.BlockSpec(b1.shape, lambda i: (0, 0)),
                pl.BlockSpec(w2.shape, lambda i: (0, 0)),
                pl.BlockSpec(b2.shape, lambda i: (0, 0)),
                pl.BlockSpec(w3.shape, lambda i: (0, 0)),
                pl.BlockSpec(b3.shape, lambda i: (0, 0)),
                pl.BlockSpec((F, tile_b), lambda i: (0, i)),           # preds, lane-dense
                pl.BlockSpec((F, tile_b), lambda i: (0, i)),           # mask, lane-dense
            ],
            out_specs=pl.BlockSpec((1, tile_b), lambda i: (0, i)),     # lane-dense row
        ),
        compiler_params=pltpu.CompilerParams(
            dimension_semantics=("parallel",),           # v7x: shard batch tiles over 2 TCs
            vmem_limit_bytes=40 << 20,                   # headroom for 2048/4096-row tiles
        ),
    )(x_flat, w1, b1, w2, b2, w3, b3, preds_t, mask_t)

    return out[0, :B]                                     # (B,) like torch.sum(..., 1)


def fcnn_reference(batch, params, forecasters_num=6):
    """Pure-JAX reference with the same masked-softmax assumption."""
    x, pe = batch
    B = x.shape[0]
    hp = jax.lax.Precision.HIGHEST
    xf = x.reshape(B, -1).astype(jnp.float32)
    h = jax.nn.relu(jnp.dot(xf, params["w1"], precision=hp) + params["b1"])
    h = jax.nn.relu(jnp.dot(h, params["w2"], precision=hp) + params["b2"])
    logits = jnp.dot(h, params["w3"], precision=hp) + params["b3"]
    preds = pe[:, :forecasters_num]
    mask = pe[:, forecasters_num:]
    keep = (mask > 0.5).astype(jnp.float32)
    masked = jnp.where(mask > 0.5, logits, jnp.float32(-1e30))
    m = jnp.max(masked, axis=1, keepdims=True)
    e = jnp.exp(masked - m) * keep
    d = jnp.sum(e, axis=1, keepdims=True)
    d = jnp.where(d == 0.0, 1.0, d)
    return jnp.sum(preds * (e / d), axis=1)


if __name__ == "__main__":
    forecasters_num = 6
    n_inputs = (11, 32, 64)
    series_len = 21
    batch_size = 4

    key = jax.random.PRNGKey(0)
    k_params, k_x, k_preds, k_mask = jax.random.split(key, 4)

    params = init_fcnn_params(k_params, forecasters_num, n_inputs, series_len)

    x = jax.random.normal(k_x, (batch_size, series_len, n_inputs[0]), jnp.float32)
    forecaster_preds = jax.random.normal(k_preds, (batch_size, forecasters_num), jnp.float32)
    presence_mask = (jax.random.uniform(k_mask, (batch_size, forecasters_num)) > 0.3
                     ).astype(jnp.float32)
    preds_to_ensemble = jnp.concatenate([forecaster_preds, presence_mask], axis=1)  # (B, 2F)

    out = fcnn_forward((x, preds_to_ensemble), params, forecasters_num)
    jax.block_until_ready(out)
    assert out.shape == (batch_size,)

    ref = fcnn_reference((x, preds_to_ensemble), params, forecasters_num)
    assert jnp.allclose(out, ref, rtol=1e-2, atol=1e-2), (out, ref)
    print("KERNEL_OK")
</pallas_src>

<mosaic_0001>
module attributes {stable_mosaic.version = 11 : i64} {
  func.func @_fcnn_kernel(%arg0: i32, %arg1: memref<128x231xf32, #tpu.memory_space<vmem>>, %arg2: memref<231x32xf32, #tpu.memory_space<vmem>>, %arg3: memref<1x32xf32, #tpu.memory_space<vmem>>, %arg4: memref<32x64xf32, #tpu.memory_space<vmem>>, %arg5: memref<1x64xf32, #tpu.memory_space<vmem>>, %arg6: memref<64x6xf32, #tpu.memory_space<vmem>>, %arg7: memref<1x6xf32, #tpu.memory_space<vmem>>, %arg8: memref<6x128xf32, #tpu.memory_space<vmem>>, %arg9: memref<6x128xf32, #tpu.memory_space<vmem>>, %arg10: memref<1x128xf32, #tpu.memory_space<vmem>>) attributes {dimension_semantics = [#tpu.dimension_semantics<parallel>], iteration_bounds = array<i64: 1>, scalar_prefetch = 0 : i64, scratch_operands = 0 : i64, tpu.core_type = #tpu.core_type<tc>, window_params = [{transform_indices = @transform_0, window_bounds = array<i64: 128, 231>}, {pipeline_mode = #tpu.pipeline_mode<synchronous>, transform_indices = @transform_1, window_bounds = array<i64: 231, 32>}, {pipeline_mode = #tpu.pipeline_mode<synchronous>, transform_indices = @transform_2, window_bounds = array<i64: 1, 32>}, {pipeline_mode = #tpu.pipeline_mode<synchronous>, transform_indices = @transform_3, window_bounds = array<i64: 32, 64>}, {pipeline_mode = #tpu.pipeline_mode<synchronous>, transform_indices = @transform_4, window_bounds = array<i64: 1, 64>}, {pipeline_mode = #tpu.pipeline_mode<synchronous>, transform_indices = @transform_5, window_bounds = array<i64: 64, 6>}, {pipeline_mode = #tpu.pipeline_mode<synchronous>, transform_indices = @transform_6, window_bounds = array<i64: 1, 6>}, {transform_indices = @transform_7, window_bounds = array<i64: 6, 128>}, {transform_indices = @transform_8, window_bounds = array<i64: 6, 128>}, {transform_indices = @transform_9, window_bounds = array<i64: 1, 128>}]} {
    %c0 = arith.constant 0 : index
    %c0_0 = arith.constant 0 : index
    %0 = vector.load %arg1[%c0, %c0_0] : memref<128x231xf32, #tpu.memory_space<vmem>>, vector<128x231xf32>
    %c0_1 = arith.constant 0 : index
    %c0_2 = arith.constant 0 : index
    %1 = vector.load %arg2[%c0_1, %c0_2] : memref<231x32xf32, #tpu.memory_space<vmem>>, vector<231x32xf32>
    %cst = arith.constant dense<0.000000e+00> : vector<128x32xf32>
    %2 = tpu.matmul %0, %1, %cst {dimension_numbers = #tpu.dot_dimension_numbers<[1], [0], [0], [1], [0, 0, 1, 1], [], []>} : vector<128x231xf32>, vector<231x32xf32>, vector<128x32xf32> -> vector<128x32xf32>
    %c0_3 = arith.constant 0 : index
    %c0_4 = arith.constant 0 : index
    %3 = vector.load %arg3[%c0_3, %c0_4] : memref<1x32xf32, #tpu.memory_space<vmem>>, vector<1x32xf32>
    %4 = vector.broadcast %3 : vector<1x32xf32> to vector<128x32xf32>
    %5 = arith.addf %2, %4 : vector<128x32xf32>
    %cst_5 = arith.constant 0.000000e+00 : f32
    %6 = vector.broadcast %cst_5 : f32 to vector<128x32xf32>
    %7 = arith.maximumf %5, %6 : vector<128x32xf32>
    %c0_6 = arith.constant 0 : index
    %c0_7 = arith.constant 0 : index
    %8 = vector.load %arg4[%c0_6, %c0_7] : memref<32x64xf32, #tpu.memory_space<vmem>>, vector<32x64xf32>
    %cst_8 = arith.constant dense<0.000000e+00> : vector<128x64xf32>
    %9 = tpu.matmul %7, %8, %cst_8 {dimension_numbers = #tpu.dot_dimension_numbers<[1], [0], [0], [1], [0, 0, 1, 1], [], []>} : vector<128x32xf32>, vector<32x64xf32>, vector<128x64xf32> -> vector<128x64xf32>
    %c0_9 = arith.constant 0 : index
    %c0_10 = arith.constant 0 : index
    %10 = vector.load %arg5[%c0_9, %c0_10] : memref<1x64xf32, #tpu.memory_space<vmem>>, vector<1x64xf32>
    %11 = vector.broadcast %10 : vector<1x64xf32> to vector<128x64xf32>
    %12 = arith.addf %9, %11 : vector<128x64xf32>
    %cst_11 = arith.constant 0.000000e+00 : f32
    %13 = vector.broadcast %cst_11 : f32 to vector<128x64xf32>
    %14 = arith.maximumf %12, %13 : vector<128x64xf32>
    %c0_12 = arith.constant 0 : index
    %c0_13 = arith.constant 0 : index
    %15 = vector.load %arg6[%c0_12, %c0_13] : memref<64x6xf32, #tpu.memory_space<vmem>>, vector<64x6xf32>
    %cst_14 = arith.constant dense<0.000000e+00> : vector<128x6xf32>
    %16 = tpu.matmul %14, %15, %cst_14 {dimension_numbers = #tpu.dot_dimension_numbers<[1], [0], [0], [1], [0, 0, 1, 1], [], []>} : vector<128x64xf32>, vector<64x6xf32>, vector<128x6xf32> -> vector<128x6xf32>
    %c0_15 = arith.constant 0 : index
    %c0_16 = arith.constant 0 : index
    %17 = vector.load %arg7[%c0_15, %c0_16] : memref<1x6xf32, #tpu.memory_space<vmem>>, vector<1x6xf32>
    %18 = vector.broadcast %17 : vector<1x6xf32> to vector<128x6xf32>
    %19 = arith.addf %16, %18 : vector<128x6xf32>
    %20 = tpu.transpose %19, [1, 0] : vector<128x6xf32> -> vector<6x128xf32>
    %c0_17 = arith.constant 0 : index
    %c0_18 = arith.constant 0 : index
    %21 = vector.load %arg8[%c0_17, %c0_18] : memref<6x128xf32, #tpu.memory_space<vmem>>, vector<6x128xf32>
    %c0_19 = arith.constant 0 : index
    %c0_20 = arith.constant 0 : index
    %22 = vector.load %arg9[%c0_19, %c0_20] : memref<6x128xf32, #tpu.memory_space<vmem>>, vector<6x128xf32>
    %cst_21 = arith.constant 5.000000e-01 : f32
    %23 = vector.broadcast %cst_21 : f32 to vector<6x128xf32>
    %24 = arith.cmpf ogt, %22, %23 : vector<6x128xf32>
    %25 = arith.extui %24 : vector<6x128xi1> to vector<6x128xi32>
    %26 = arith.sitofp %25 : vector<6x128xi32> to vector<6x128xf32>
    %cst_22 = arith.constant -1.000000e+30 : f32
    %27 = vector.broadcast %cst_22 : f32 to vector<6x128xf32>
    %28 = arith.select %24, %20, %27 : vector<6x128xi1>, vector<6x128xf32>
    %cst_23 = arith.constant dense<0xFF800000> : vector<128xf32>
    %29 = vector.multi_reduction <maximumf>, %28, %cst_23 [0] : vector<6x128xf32> to vector<128xf32>
    %30 = vector.shape_cast %29 : vector<128xf32> to vector<1x128xf32>
    %31 = vector.broadcast %30 : vector<1x128xf32> to vector<6x128xf32>
    %32 = arith.subf %28, %31 : vector<6x128xf32>
    %33 = math.exp %32 : vector<6x128xf32>
    %34 = arith.mulf %33, %26 : vector<6x128xf32>
    %cst_24 = arith.constant dense<0.000000e+00> : vector<128xf32>
    %35 = vector.multi_reduction <add>, %34, %cst_24 [0] : vector<6x128xf32> to vector<128xf32>
    %36 = vector.shape_cast %35 : vector<128xf32> to vector<1x128xf32>
    %cst_25 = arith.constant 0.000000e+00 : f32
    %37 = vector.broadcast %cst_25 : f32 to vector<1x128xf32>
    %38 = arith.cmpf oeq, %36, %37 : vector<1x128xf32>
    %cst_26 = arith.constant 1.000000e+00 : f32
    %39 = vector.broadcast %cst_26 : f32 to vector<1x128xf32>
    %40 = arith.select %38, %39, %36 : vector<1x128xi1>, vector<1x128xf32>
    %41 = tpu.reciprocal %40 {approx = true} : vector<1x128xf32> -> vector<1x128xf32>
    %42 = vector.broadcast %41 : vector<1x128xf32> to vector<6x128xf32>
    %43 = arith.mulf %34, %42 : vector<6x128xf32>
    %44 = arith.mulf %21, %43 : vector<6x128xf32>
    %cst_27 = arith.constant dense<0.000000e+00> : vector<128xf32>
    %45 = vector.multi_reduction <add>, %44, %cst_27 [0] : vector<6x128xf32> to vector<128xf32>
    %46 = vector.shape_cast %45 : vector<128xf32> to vector<1x128xf32>
    %c0_28 = arith.constant 0 : index
    %c0_29 = arith.constant 0 : index
    %47 = vector.load %arg10[%c0_28, %c0_29] : memref<1x128xf32, #tpu.memory_space<vmem>>, vector<1x128xf32>
    tpu.vector_store %arg10[%c0_28, %c0_29], %46 {strides = array<i32>} : memref<1x128xf32, #tpu.memory_space<vmem>>, vector<1x128xf32>,
    return
  }
  func.func @transform_0(%arg0: i32) -> (i32, i32) {
    %c0_i32 = arith.constant 0 : i32
    %c0_i32_0 = arith.constant 0 : i32
    return %arg0, %c0_i32 : i32, i32
  }
  func.func @transform_1(%arg0: i32) -> (i32, i32) {
    %c0_i32 = arith.constant 0 : i32
    %c0_i32_0 = arith.constant 0 : i32
    %c0_i32_1 = arith.constant 0 : i32
    return %c0_i32, %c0_i32_0 : i32, i32
  }
  func.func @transform_2(%arg0: i32) -> (i32, i32) {
    %c0_i32 = arith.constant 0 : i32
    %c0_i32_0 = arith.constant 0 : i32
    %c0_i32_1 = arith.constant 0 : i32
    return %c0_i32, %c0_i32_0 : i32, i32
  }
  func.func @transform_3(%arg0: i32) -> (i32, i32) {
    %c0_i32 = arith.constant 0 : i32
    %c0_i32_0 = arith.constant 0 : i32
    %c0_i32_1 = arith.constant 0 : i32
    return %c0_i32, %c0_i32_0 : i32, i32
  }
  func.func @transform_4(%arg0: i32) -> (i32, i32) {
    %c0_i32 = arith.constant 0 : i32
    %c0_i32_0 = arith.constant 0 : i32
    %c0_i32_1 = arith.constant 0 : i32
    return %c0_i32, %c0_i32_0 : i32, i32
  }
  func.func @transform_5(%arg0: i32) -> (i32, i32) {
    %c0_i32 = arith.constant 0 : i32
    %c0_i32_0 = arith.constant 0 : i32
    %c0_i32_1 = arith.constant 0 : i32
    return %c0_i32, %c0_i32_0 : i32, i32
  }
  func.func @transform_6(%arg0: i32) -> (i32, i32) {
    %c0_i32 = arith.constant 0 : i32
    %c0_i32_0 = arith.constant 0 : i32
    %c0_i32_1 = arith.constant 0 : i32
    return %c0_i32, %c0_i32_0 : i32, i32
  }
  func.func @transform_7(%arg0: i32) -> (i32, i32) {
    %c0_i32 = arith.constant 0 : i32
    %c0_i32_0 = arith.constant 0 : i32
    return %c0_i32, %arg0 : i32, i32
  }
  func.func @transform_8(%arg0: i32) -> (i32, i32) {
    %c0_i32 = arith.constant 0 : i32
    %c0_i32_0 = arith.constant 0 : i32
    return %c0_i32, %arg0 : i32, i32
  }
  func.func @transform_9(%arg0: i32) -> (i32, i32) {
    %c0_i32 = arith.constant 0 : i32
    %c0_i32_0 = arith.constant 0 : i32
    return %c0_i32, %arg0 : i32, i32
  }
}

</mosaic_0001>

<bundles_post_ra>
// kernel: tpu_custom_call.1
= control target key start
LH: loop header
LB: loop body
LE: loop exit
PB: predicated region body
PF: predicated region fallthrough
CT: control target
= control target key end

     0   :  { %v1207_v3 = vmov 0.0|0.0   ;;  %vm181_vm0 = vcmask 842752   ;;  %s1591_s0 = inlined_call_operand.vmem [shape: f32[4,231], index: 0, kind: input, shape index: {}]   ;;  %s1592_s1 = inlined_call_operand.vmem [shape: f32[231,32], index: 1, kind: input, shape index: {}]   ;;  %s1593_s2 = inlined_call_operand.vmem [shape: f32[1,32], index: 2, kind: input, shape index: {}]   ;;  %s1594_s3 = inlined_call_operand.vmem [shape: f32[32,64], index: 3, kind: input, shape index: {}]   ;;  %s1595_s4 = inlined_call_operand.vmem [shape: f32[1,64], index: 4, kind: input, shape index: {}]   ;;  %s1596_s5 = inlined_call_operand.vmem [shape: f32[64,6], index: 5, kind: input, shape index: {}]   ;;  %s1597_s6 = inlined_call_operand.vmem [shape: f32[1,6], index: 6, kind: input, shape index: {}]   ;;  %s1598_s7 = inlined_call_operand.vmem [shape: f32[6,128], index: 7, kind: input, shape index: {}]   ;;  %s1599_s8 = inlined_call_operand.vmem [shape: f32[6,128], index: 8, kind: input, shape index: {}]   ;;  %s1600_s9 = inlined_call_operand.hbm [shape: f32[1,128], index: 9, kind: output, shape index: {}]  }
   0x1   :  { %v65_v0 = vld [vmem:[%s1592_s1] sm:$0xff]  ;;  %v66_v1 = vld [vmem:[%s1592_s1 + $0x8] sm:$0xff]  ;;  %v67_v2 = vld [vmem:[%s1592_s1 + $0x10] sm:$0xff]  ;;  %1062 = vmatprep.subr.bf16.mxu0 %v1207_v3 }
   0x2   :  { %v1063_v4 = vpack.c.bf16 %v66_v1, %v65_v0  ;;  %v68_v5 = vld [vmem:[%s1592_s1 + $0x18] sm:$0xff]  ;;  %v69_v7 = vld [vmem:[%s1592_s1 + $0x20] sm:$0xff]  ;;  %v70_v8 = vld [vmem:[%s1592_s1 + $0x28] sm:$0xff] }
   0x3   :  { %v1066_v6 = vpack.c.bf16 %v68_v5, %v67_v2  ;;  %v1069_v9 = vpack.c.bf16 %v70_v8, %v69_v7  ;;  %v71_v10 = vld [vmem:[%s1592_s1 + $0x30] sm:$0xff]  ;;  %v72_v11 = vld [vmem:[%s1592_s1 + $0x38] sm:$0xff]  ;;  %v1133_v12 = vld [vmem:[%s1591_s0 + $0x4] ss:$8 sps:$4 sm:$0xff]  }
   0x4   :  { %1064 = vmatpush1.bf16.msra.mxu0 %v1063_v4  ;;  %v1072_v13 = vpack.c.bf16 %v72_v11, %v71_v10  ;;  %v73_v14 = vld [vmem:[%s1592_s1 + $0x40] sm:$0xff]  ;;  %v74_v15 = vld [vmem:[%s1592_s1 + $0x48] sm:$0xff]  ;;  %895 = vmatprep.mubr.msk.f32.mxu0 %vm181_vm0, %v1133_v12  ;;  %v75_v17 = vld [vmem:[%s1592_s1 + $0x50] sm:$0xff] }
   0x5   :  { %1065 = vmatprep.subr.bf16.mxu0 %v1207_v3  ;;  %v1075_v16 = vpack.c.bf16 %v74_v15, %v73_v14  ;;  %v76_v18 = vld [vmem:[%s1592_s1 + $0x58] sm:$0xff]  ;;  %v77_v20 = vld [vmem:[%s1592_s1 + $0x60] sm:$0xff]  ;;  %v78_v21 = vld [vmem:[%s1592_s1 + $0x68] sm:$0xff] }
   0x6   :  { %v1078_v19 = vpack.c.bf16 %v76_v18, %v75_v17  ;;  %v1081_v22 = vpack.c.bf16 %v78_v21, %v77_v20  ;;  %v79_v23 = vld [vmem:[%s1592_s1 + $0x70] sm:$0xff]  ;;  %v80_v24 = vld [vmem:[%s1592_s1 + $0x78] sm:$0xff]  ;;  %v81_v26 = vld [vmem:[%s1592_s1 + $0x80] sm:$0xff] }
   0x7   :  { %v1084_v25 = vpack.c.bf16 %v80_v24, %v79_v23  ;;  %v82_v27 = vld [vmem:[%s1592_s1 + $0x88] sm:$0xff] }
   0x8   :  { %1067 = vmatpush1.bf16.msra.mxu0 %v1066_v6  ;;  %v1087_v28 = vpack.c.bf16 %v82_v27, %v81_v26 }
   0x9   :  { %1068 = vmatprep.subr.bf16.mxu0 %v1207_v3 }
   0xc   :  { %1070 = vmatpush1.bf16.msra.mxu0 %v1069_v9 }
   0xd   :  { %1071 = vmatprep.subr.bf16.mxu0 %v1207_v3 }
  0x10   :  { %1073 = vmatpush1.bf16.msra.mxu0 %v1072_v13 }
  0x11   :  { %1074 = vmatprep.subr.bf16.mxu0 %v1207_v3 }
  0x14   :  { %1076 = vmatpush1.bf16.msra.mxu0 %v1075_v16 }
  0x15   :  { %1077 = vmatprep.subr.bf16.mxu0 %v1207_v3 }
  0x18   :  { %1079 = vmatpush1.bf16.msra.mxu0 %v1078_v19 }
  0x19   :  { %1080 = vmatprep.subr.bf16.mxu0 %v1207_v3 }
  0x1c   :  { %1082 = vmatpush1.bf16.msra.mxu0 %v1081_v22 }
  0x1d   :  { %1083 = vmatprep.subr.bf16.mxu0 %v1207_v3 }
  0x20   :  { %1085 = vmatpush1.bf16.msra.mxu0 %v1084_v25 }
  0x21   :  { %14 = vsyncpa [#allocation3], 0  ;;  %1086 = vmatprep.subr.bf16.mxu0 %v1207_v3  ;;  %v83_v29 = vld [vmem:[%s1592_s1 + $0x90] sm:$0xff]  ;;  %v84_v30 = vld [vmem:[%s1592_s1 + $0x98] sm:$0xff]  ;;  %v1208_v44 = vmov 0.0   ;;  %vm214_vm1 = vcmask 1046528  }
  0x22   :  { %v1090_v31 = vpack.c.bf16 %v84_v30, %v83_v29  ;;  %v85_v32 = vld [vmem:[%s1592_s1 + $0xa0] sm:$0xff]  ;;  %v86_v33 = vld [vmem:[%s1592_s1 + $0xa8] sm:$0xff]  ;;  %v87_v35 = vld [vmem:[%s1592_s1 + $0xb0] sm:$0xff]  ;;  %vm390_vm2 = vcmask 261120   ;;  %vm615_vm3 = vcmask 523264   ;;  %vm847_vm5 = vcmask 1045504  }
  0x23   :  { %v1093_v34 = vpack.c.bf16 %v86_v33, %v85_v32  ;;  %v88_v36 = vld [vmem:[%s1592_s1 + $0xb8] sm:$0xff]  ;;  %v89_v38 = vld [vmem:[%s1592_s1 + $0xc0] sm:$0xff]  ;;  %v90_v39 = vld [vmem:[%s1592_s1 + $0xc8] sm:$0xff]  ;;  %s1209_s28 = smov [#allocation2]  }
  0x24   :  { %1088 = vmatpush1.bf16.msra.mxu0 %v1087_v28  ;;  %v1096_v37 = vpack.c.bf16 %v88_v36, %v87_v35  ;;  %v1099_v40 = vpack.c.bf16 %v90_v39, %v89_v38  ;;  %v91_v41 = vld [vmem:[%s1592_s1 + $0xd0] sm:$0xff]  ;;  %v92_v42 = vld [vmem:[%s1592_s1 + $0xd8] sm:$0xff]  ;;  %v93_v45 = vld [vmem:[%s1592_s1 + $0xe0] sm:$0x7f]  ;;  %s885_s29 = sshll.u32 %s1209_s28, 4  ;;  %s886_s29 = int_to_ptr.vmem [resolvable:$true] %s885_s29 }
  0x25   :  { %1089 = vmatprep.subr.bf16.mxu0 %v1207_v3  ;;  %v1102_v43 = vpack.c.bf16 %v92_v42, %v91_v41  ;;  %v1131_v46 = vld [vmem:[%s1591_s0] ss:$8 sps:$4 sm:$0xff]   ;;  %v1134_v47 = vld [vmem:[%s1591_s0 + $0x14] ss:$8 sps:$4 sm:$0xff]   ;;  %v1136_v48 = vld [vmem:[%s1591_s0 + $0x10] ss:$8 sps:$4 sm:$0xff]   ;;  %p1188_p1 = scmp.lt.s32.totalorder %s886_s29, %s886_s29 }
  0x26   :  { %v1137_v49 = vld [vmem:[%s1591_s0 + $0x24] ss:$8 sps:$4 sm:$0xff]   ;;  %v1139_v50 = vld [vmem:[%s1591_s0 + $0x20] ss:$8 sps:$4 sm:$0xff]   ;;  %v1140_v51 = vld [vmem:[%s1591_s0 + $0x34] ss:$8 sps:$4 sm:$0xff]  }
  0x27   :  { %v1142_v52 = vld [vmem:[%s1591_s0 + $0x30] ss:$8 sps:$4 sm:$0xff]   ;;  %v1143_v53 = vld [vmem:[%s1591_s0 + $0x44] ss:$8 sps:$4 sm:$0xff]   ;;  %v1145_v54 = vld [vmem:[%s1591_s0 + $0x40] ss:$8 sps:$4 sm:$0xff]  }
  0x28   :  { %1091 = vmatpush1.bf16.msra.mxu0 %v1090_v31  ;;  %v1146_v55 = vld [vmem:[%s1591_s0 + $0x54] ss:$8 sps:$4 sm:$0xff]   ;;  %v1148_v56 = vld [vmem:[%s1591_s0 + $0x50] ss:$8 sps:$4 sm:$0xff]   ;;  %v1149_v57 = vld [vmem:[%s1591_s0 + $0x64] ss:$8 sps:$4 sm:$0xff]  }
  0x29   :  { %1092 = vmatprep.subr.bf16.mxu0 %v1207_v3  ;;  %v1151_v58 = vld [vmem:[%s1591_s0 + $0x60] ss:$8 sps:$4 sm:$0xff]   ;;  %v1152_v59 = vld [vmem:[%s1591_s0 + $0x74] ss:$8 sps:$4 sm:$0xff]   ;;  %v1154_v60 = vld [vmem:[%s1591_s0 + $0x70] ss:$8 sps:$4 sm:$0xff]  }
  0x2a   :  { %v1155_v61 = vld [vmem:[%s1591_s0 + $0x84] ss:$8 sps:$4 sm:$0xff]   ;;  %v1157_v62 = vld [vmem:[%s1591_s0 + $0x80] ss:$8 sps:$4 sm:$0xff]   ;;  %v1158_v63 = vld [vmem:[%s1591_s0 + $0x94] ss:$8 sps:$4 sm:$0xff]  }
  0x2b   :  { %v1160_v0 = vld [vmem:[%s1591_s0 + $0x90] ss:$8 sps:$4 sm:$0xff]   ;;  %v1161_v1 = vld [vmem:[%s1591_s0 + $0xa4] ss:$8 sps:$4 sm:$0xff]   ;;  %v1163_v2 = vld [vmem:[%s1591_s0 + $0xa0] ss:$8 sps:$4 sm:$0xff]  }
  0x2c   :  { %1094 = vmatpush1.bf16.msra.mxu0 %v1093_v34  ;;  %v1166_v4 = vld [vmem:[%s1591_s0 + $0xb0] ss:$8 sps:$4 sm:$0xff]   ;;  %v1167_v5 = vld [vmem:[%s1591_s0 + $0xc4] ss:$8 sps:$4 sm:$0xff]   ;;  %v1169_v6 = vld [vmem:[%s1591_s0 + $0xc0] ss:$8 sps:$4 sm:$0xff]  }
  0x2d   :  { %1095 = vmatprep.subr.bf16.mxu0 %v1207_v3  ;;  %v1170_v7 = vld [vmem:[%s1591_s0 + $0xd4] ss:$8 sps:$4 sm:$0xff]   ;;  %v1172_v8 = vld [vmem:[%s1591_s0 + $0xd0] ss:$8 sps:$4 sm:$0xff]   ;;  %v1173_v9 = vld [vmem:[%s1591_s0 + $0xe4] ss:$8 sps:$4 sm:$0xff]  }
  0x2e   :  { %v1175_v10 = vld [vmem:[%s1591_s0 + $0xe0] ss:$8 sps:$4 sm:$0xff]   ;;  %v1176_v11 = vld [vmem:[%s1591_s0 + $0xf4] ss:$8 sps:$4 sm:$0xff]   ;;  %v1178_v12 = vld [vmem:[%s1591_s0 + $0xf0] ss:$8 sps:$4 sm:$0xff]  }
  0x2f   :  { %v379_v13 = vld [vmem:[%s1594_s3] sm:$0xff]  ;;  %v380_v14 = vld [vmem:[%s1594_s3 + $0x8] sm:$0xff]  ;;  %v381_v16 = vld [vmem:[%s1594_s3 + $0x10] sm:$0xff]  ;;  %s1187_s30 = scalar_lea.vmem %s886_s29, 32 }
  0x30   :  { %1097 = vmatpush1.bf16.msra.mxu0 %v1096_v37  ;;  %v1104_v15 = vpack.c.bf16 %v380_v14, %v379_v13  ;;  %v382_v17 = vld [vmem:[%s1594_s3 + $0x18] sm:$0xff]  ;;  %v600_v19 = vld [vmem:[%s1596_s5] sm:$0xff]  ;;  %v601_v20 = vld [vmem:[%s1596_s5 + $0x8] sm:$0xff] }
  0x31   :  { %1098 = vmatprep.subr.bf16.mxu0 %v1207_v3  ;;  %v1108_v18 = vpack.c.bf16 %v382_v17, %v381_v16  ;;  %v1112_v21 = vpack.c.bf16 %v601_v20, %v600_v19  ;;  %v1495_v22 = vld [vmem:[%s1593_s2] ss:$0 sm:$0xff]  ;;  %v602_v28 = vld [vmem:[%s1596_s5 + $0x10] sm:$0xff]  ;;  %v603_v29 = vld [vmem:[%s1596_s5 + $0x18] sm:$0xff] }
  0x32   :  { %1105 = vmatprep.subr.bf16.mxu1 %v1104_v15  ;;  %v1116_v33 = vpack.c.bf16 %v603_v29, %v602_v28  ;;  %v604_v35 = vld [vmem:[%s1596_s5 + $0x20] sm:$0xff]  ;;  %v605_v36 = vld [vmem:[%s1596_s5 + $0x28] sm:$0xff]  ;;  %v606_v42 = vld [vmem:[%s1596_s5 + $0x30] sm:$0xff] }
  0x33   :  { %1107 = vmatpush3.bf16.msra.mxu1 %v1104_v15 }
  0x34   :  { %1100 = vmatpush1.bf16.msra.mxu0 %v1099_v40  ;;  %1109 = vmatprep.subr.bf16.mxu1 %v1108_v18  ;;  %v1120_v40 = vpack.c.bf16 %v605_v36, %v604_v35 }
  0x35   :  { %1101 = vmatprep.subr.bf16.mxu0 %v1207_v3  ;;  %v1164_v3 = vld [vmem:[%s1591_s0 + $0xb4] ss:$8 sps:$4 sm:$0xff]   ;;  %s1183_s0 = scalar_lea.vmem %s886_s29, 16 }
  0x36   :  { %p1184_p0 = scmp.ne.s32.totalorder %s886_s29, %s1183_s0  ;;  %p1189_p2 = scmp.lt.s32.totalorder %s1187_s30, %s1183_s0 }
  0x37   :  { %1111 = vmatpush3.bf16.msra.mxu1 %v1108_v18 }
  0x38   :  { %1103 = vmatpush1.bf16.msra.mxu0 %v1102_v43  ;;  %1113 = vmatprep.subr.bf16.mxu1 %v1112_v21  ;;  %v607_v43 = vld [vmem:[%s1596_s5 + $0x38] sm:$0xff]  ;;  %p1190_p3 = por %p1189_p2, %p1188_p1 }
  0x39   :  { %274 = vmatprep.subr.mxu0 %v1208_v44 }
  0x3a   :  { %p1191_p4 = pnand %p1190_p3, %p1184_p0 }
  0x3c   :  { %894 = vmatpush1.msk.msra.mxu0 %vm214_vm1, %v93_v45 }
  0x3d   :  { %283 = vmatmul.mubr.f32.vlgmr.msra.gmra.mrb[0].mxu0 %v1131_v46 }
  0x3e   :  { %896 = vmatprep.mubr.msk.f32.mxu0 %vm181_vm0, %v1134_v47 }
  0x41   :  { %288 = vmatmul.mubr.f32.gmra.mrb[2].mxu0 %v1136_v48  ;;  %v1124_v48 = vpack.c.bf16 %v607_v43, %v606_v42 }
  0x42   :  { %897 = vmatprep.mubr.msk.f32.mxu0 %vm181_vm0, %v1137_v49 }
  0x45   :  { %293 = vmatmul.mubr.f32.gmra.mrb[4].mxu0 %v1139_v50 }
  0x46   :  { %898 = vmatprep.mubr.msk.f32.mxu0 %vm181_vm0, %v1140_v51 }
  0x49   :  { %298 = vmatmul.mubr.f32.gmra.mrb[6].mxu0 %v1142_v52 }
  0x4a   :  { %899 = vmatprep.mubr.msk.f32.mxu0 %vm181_vm0, %v1143_v53 }
  0x4d   :  { %303 = vmatmul.mubr.f32.gmra.mrb[8].mxu0 %v1145_v54 }
  0x4e   :  { %900 = vmatprep.mubr.msk.f32.mxu0 %vm181_vm0, %v1146_v55 }
  0x51   :  { %308 = vmatmul.mubr.f32.gmra.mrb[10].mxu0 %v1148_v56 }
  0x52   :  { %901 = vmatprep.mubr.msk.f32.mxu0 %vm181_vm0, %v1149_v57 }
  0x55   :  { %313 = vmatmul.mubr.f32.gmra.mrb[12].mxu0 %v1151_v58 }
  0x56   :  { %902 = vmatprep.mubr.msk.f32.mxu0 %vm181_vm0, %v1152_v59 }
  0x59   :  { %318 = vmatmul.mubr.f32.gmra.mrb[14].mxu0 %v1154_v60 }
  0x5a   :  { %903 = vmatprep.mubr.msk.f32.mxu0 %vm181_vm0, %v1155_v61 }
  0x5d   :  { %323 = vmatmul.mubr.f32.gmra.mrb[16].mxu0 %v1157_v62 }
  0x5e   :  { %904 = vmatprep.mubr.msk.f32.mxu0 %vm181_vm0, %v1158_v63 }
  0x61   :  { %328 = vmatmul.mubr.f32.gmra.mrb[18].mxu0 %v1160_v0 }
  0x62   :  { %905 = vmatprep.mubr.msk.f32.mxu0 %vm181_vm0, %v1161_v1 }
  0x65   :  { %333 = vmatmul.mubr.f32.gmra.mrb[20].mxu0 %v1163_v2 }
  0x66   :  { %906 = vmatprep.mubr.msk.f32.mxu0 %vm181_vm0, %v1164_v3 }
  0x69   :  { %338 = vmatmul.mubr.f32.gmra.mrb[22].mxu0 %v1166_v4 }
  0x6a   :  { %907 = vmatprep.mubr.msk.f32.mxu0 %vm181_vm0, %v1167_v5 }
  0x6d   :  { %343 = vmatmul.mubr.f32.gmra.mrb[24].mxu0 %v1169_v6 }
  0x6e   :  { %908 = vmatprep.mubr.msk.f32.mxu0 %vm181_vm0, %v1170_v7 }
  0x71   :  { %348 = vmatmul.mubr.f32.gmra.mrb[26].mxu0 %v1172_v8 }
  0x72   :  { %909 = vmatprep.mubr.msk.f32.mxu0 %vm181_vm0, %v1173_v9 }
  0x75   :  { %353 = vmatmul.mubr.f32.gmra.mrb[28].mxu0 %v1175_v10 }
  0x76   :  { %910 = vmatprep.mubr.msk.f32.mxu0 %vm181_vm0, %v1176_v11 }
  0x79   :  { %358 = vmatmul.mubr.f32.gmra.mrb[30].mxu0 %v1178_v12 }
 0x110   :  { %v284_v23 = vpop.f32.mrb[0].mxu0 }
 0x111   :  { %v285_v24 = vadd.f32 %v1495_v22, %v284_v23  ;;  %v286_v25 = vpop.f32.mrb[1].mxu0 }
 0x113   :  { %v363_v26 = vmax.f32 %v285_v24, 0.0 }
 0x114   :  { %v289_v27 = vpop.f32.mrb[2].mxu0 }
 0x115   :  { %v290_v30 = vadd.f32 %v1495_v22, %v289_v27  ;;  %v291_v31 = vpop.f32.mrb[3].mxu0  ;;  %998 = vmatprep.mubr.msk.f32.mxu1 %vm390_vm2, %v363_v26 }
 0x117   :  { %v364_v32 = vmax.f32 %v290_v30, 0.0 }
 0x118   :  { %v294_v34 = vpop.f32.mrb[4].mxu0 }
 0x119   :  { %v295_v37 = vadd.f32 %v1495_v22, %v294_v34  ;;  %v296_v38 = vpop.f32.mrb[5].mxu0  ;;  %999 = vmatmul.mubr.msk.f32.vlgmr.msra.gmra.mrb[0].mxu1 %vm390_vm2, %v364_v32  ;;  %v911_v34 = vld [vmem:[%s1595_s4] ss:$0 sm:$0xff] }
 0x11a   :  { %1115 = vmatpush3.bf16.msra.mxu1 %v1112_v21 }
 0x11b   :  { %v365_v39 = vmax.f32 %v295_v37, 0.0  ;;  %1117 = vmatprep.subr.bf16.mxu1 %v1116_v33 }
 0x11c   :  { %v299_v41 = vpop.f32.mrb[6].mxu0 }
 0x11d   :  { %v300_v45 = vadd.f32 %v1495_v22, %v299_v41  ;;  %v301_v46 = vpop.f32.mrb[7].mxu0  ;;  %1001 = vmatprep.mubr.msk.f32.mxu1 %vm390_vm2, %v365_v39 }
 0x11e   :  { %1119 = vmatpush3.bf16.msra.mxu1 %v1116_v33 }
 0x11f   :  { %v366_v47 = vmax.f32 %v300_v45, 0.0  ;;  %1121 = vmatprep.subr.bf16.mxu1 %v1120_v40 }
 0x120   :  { %v304_v49 = vpop.f32.mrb[8].mxu0 }
 0x121   :  { %v305_v50 = vadd.f32 %v1495_v22, %v304_v49  ;;  %v306_v51 = vpop.f32.mrb[9].mxu0  ;;  %1002 = vmatmul.mubr.msk.f32.gmra.mrb[2].mxu1 %vm390_vm2, %v366_v47 }
 0x122   :  { %1123 = vmatpush3.bf16.msra.mxu1 %v1120_v40 }
 0x123   :  { %v367_v52 = vmax.f32 %v305_v50, 0.0  ;;  %1125 = vmatprep.subr.bf16.mxu1 %v1124_v48 }
 0x124   :  { %v309_v53 = vpop.f32.mrb[10].mxu0 }
 0x125   :  { %v310_v54 = vadd.f32 %v1495_v22, %v309_v53  ;;  %v311_v55 = vpop.f32.mrb[11].mxu0  ;;  %1004 = vmatprep.mubr.msk.f32.mxu1 %vm390_vm2, %v367_v52 }
 0x126   :  { %1127 = vmatpush3.bf16.msra.mxu1 %v1124_v48 }
 0x127   :  { %v368_v56 = vmax.f32 %v310_v54, 0.0 }
 0x128   :  { %v314_v57 = vpop.f32.mrb[12].mxu0 }
 0x129   :  { %v315_v58 = vadd.f32 %v1495_v22, %v314_v57  ;;  %v316_v59 = vpop.f32.mrb[13].mxu0  ;;  %1005 = vmatmul.mubr.msk.f32.gmra.mrb[4].mxu1 %vm390_vm2, %v368_v56 }
 0x12b   :  { %v369_v60 = vmax.f32 %v315_v58, 0.0 }
 0x12c   :  { %v319_v61 = vpop.f32.mrb[14].mxu0 }
 0x12d   :  { %v320_v62 = vadd.f32 %v1495_v22, %v319_v61  ;;  %v321_v63 = vpop.f32.mrb[15].mxu0  ;;  %1007 = vmatprep.mubr.msk.f32.mxu1 %vm390_vm2, %v369_v60 }
 0x12f   :  { %v370_v0 = vmax.f32 %v320_v62, 0.0 }
 0x130   :  { %v324_v1 = vpop.f32.mrb[16].mxu0 }
 0x131   :  { %v325_v2 = vadd.f32 %v1495_v22, %v324_v1  ;;  %v326_v3 = vpop.f32.mrb[17].mxu0  ;;  %1008 = vmatmul.mubr.msk.f32.gmra.mrb[6].mxu1 %vm390_vm2, %v370_v0 }
 0x133   :  { %v371_v4 = vmax.f32 %v325_v2, 0.0 }
 0x134   :  { %v329_v5 = vpop.f32.mrb[18].mxu0 }
 0x135   :  { %v330_v6 = vadd.f32 %v1495_v22, %v329_v5  ;;  %v331_v7 = vpop.f32.mrb[19].mxu0  ;;  %1010 = vmatprep.mubr.msk.f32.mxu1 %vm390_vm2, %v371_v4 }
 0x137   :  { %v372_v8 = vmax.f32 %v330_v6, 0.0 }
 0x138   :  { %v334_v9 = vpop.f32.mrb[20].mxu0 }
 0x139   :  { %v335_v10 = vadd.f32 %v1495_v22, %v334_v9  ;;  %v336_v11 = vpop.f32.mrb[21].mxu0  ;;  %1011 = vmatmul.mubr.msk.f32.gmra.mrb[8].mxu1 %vm390_vm2, %v372_v8 }
 0x13b   :  { %v373_v12 = vmax.f32 %v335_v10, 0.0 }
 0x13c   :  { %v339_v13 = vpop.f32.mrb[22].mxu0 }
 0x13d   :  { %v340_v14 = vadd.f32 %v1495_v22, %v339_v13  ;;  %v341_v15 = vpop.f32.mrb[23].mxu0  ;;  %1013 = vmatprep.mubr.msk.f32.mxu1 %vm390_vm2, %v373_v12 }
 0x13f   :  { %v374_v16 = vmax.f32 %v340_v14, 0.0 }
 0x140   :  { %v344_v17 = vpop.f32.mrb[24].mxu0 }
 0x141   :  { %v345_v18 = vadd.f32 %v1495_v22, %v344_v17  ;;  %v346_v19 = vpop.f32.mrb[25].mxu0  ;;  %1014 = vmatmul.mubr.msk.f32.gmra.mrb[10].mxu1 %vm390_vm2, %v374_v16 }
 0x142   :  { %v928_v19 = vld [vmem:[%s1597_s6] ss:$0 sm:$0xff] }
 0x143   :  { %v375_v20 = vmax.f32 %v345_v18, 0.0 }
 0x144   :  { %v349_v21 = vpop.f32.mrb[26].mxu0 }
 0x145   :  { %v350_v23 = vadd.f32 %v1495_v22, %v349_v21  ;;  %v351_v24 = vpop.f32.mrb[27].mxu0  ;;  %1016 = vmatprep.mubr.msk.f32.mxu1 %vm390_vm2, %v375_v20 }
 0x147   :  { %v376_v25 = vmax.f32 %v350_v23, 0.0 }
 0x148   :  { %v354_v26 = vpop.f32.mrb[28].mxu0 }
 0x149   :  { %v355_v27 = vadd.f32 %v1495_v22, %v354_v26  ;;  %v356_v28 = vpop.f32.mrb[29].mxu0  ;;  %1017 = vmatmul.mubr.msk.f32.gmra.mrb[12].mxu1 %vm390_vm2, %v376_v25 }
 0x14b   :  { %v377_v29 = vmax.f32 %v355_v27, 0.0 }
 0x14c   :  { %v359_v30 = vpop.f32.mrb[30].mxu0 }
 0x14d   :  { %v360_v31 = vadd.f32 %v1495_v22, %v359_v30  ;;  %v361_v32 = vpop.f32.mrb[31].mxu0  ;;  %1019 = vmatprep.mubr.msk.f32.mxu1 %vm390_vm2, %v377_v29 }
 0x14f   :  { %v378_v33 = vmax.f32 %v360_v31, 0.0 }
 0x151   :  { %1020 = vmatmul.mubr.msk.f32.gmra.mrb[14].mxu1 %vm390_vm2, %v378_v33 }
 0x1ec   :  { %v1000_v35 = vpop.f32.mrb[0].mxu1 }
 0x1ed   :  { %v511_v36 = vadd.f32 %v1000_v35, %v911_v34  ;;  %v505_v37 = vpop.f32.mrb[1].mxu1 }
 0x1ee   :  { %v506_v38 = vadd.f32 %v911_v34, %v505_v37 }
 0x1ef   :  { %v585_v40 = vmax.f32 %v511_v36, 0.0 }
 0x1f0   :  { %v584_v39 = vmax.f32 %v506_v38, 0.0 }
 0x1f2   :  { %1038 = vmatprep.mubr.msk.f32.mxu1 %vm615_vm3, %v584_v39 }
 0x1f3   :  { %1039 = vmatmul.mubr.msk.f32.vlgmr.msra.gmra.mrb[16].mxu1 %vm615_vm3, %v585_v40 }
 0x1f4   :  { %v1003_v22 = vpop.f32.mrb[2].mxu1 }
 0x1f5   :  { %v521_v41 = vadd.f32 %v1003_v22, %v911_v34  ;;  %v515_v42 = vpop.f32.mrb[3].mxu1 }
 0x1f6   :  { %v516_v43 = vadd.f32 %v911_v34, %v515_v42 }
 0x1f7   :  { %v587_v46 = vmax.f32 %v521_v41, 0.0 }
 0x1f8   :  { %v586_v45 = vmax.f32 %v516_v43, 0.0 }
 0x1fa   :  { %1041 = vmatprep.mubr.msk.f32.mxu1 %vm615_vm3, %v586_v45 }
 0x1fb   :  { %1042 = vmatmul.mubr.msk.f32.gmra.mrb[18].mxu1 %vm615_vm3, %v587_v46 }
 0x1fc   :  { %v1006_v47 = vpop.f32.mrb[4].mxu1 }
 0x1fd   :  { %v531_v48 = vadd.f32 %v1006_v47, %v911_v34  ;;  %v525_v49 = vpop.f32.mrb[5].mxu1 }
 0x1fe   :  { %v526_v50 = vadd.f32 %v911_v34, %v525_v49 }
 0x1ff   :  { %v589_v52 = vmax.f32 %v531_v48, 0.0 }
 0x200   :  { %v588_v51 = vmax.f32 %v526_v50, 0.0 }
 0x202   :  { %1044 = vmatprep.mubr.msk.f32.mxu1 %vm615_vm3, %v588_v51 }
 0x203   :  { %1045 = vmatmul.mubr.msk.f32.gmra.mrb[20].mxu1 %vm615_vm3, %v589_v52 }
 0x204   :  { %v1009_v53 = vpop.f32.mrb[6].mxu1 }
 0x205   :  { %v541_v54 = vadd.f32 %v1009_v53, %v911_v34  ;;  %v535_v55 = vpop.f32.mrb[7].mxu1  ;;  %v842_v53 = vld [vmem:[%s1599_s8] sm:$0x3f] }
 0x206   :  { %v536_v56 = vadd.f32 %v911_v34, %v535_v55  ;;  %vm843_vm4 = vcmp.gt.f32.partialorder %v842_v53, 0.5 }
 0x207   :  { %v591_v58 = vmax.f32 %v541_v54, 0.0 }
 0x208   :  { %v590_v57 = vmax.f32 %v536_v56, 0.0 }
 0x20a   :  { %1047 = vmatprep.mubr.msk.f32.mxu1 %vm615_vm3, %v590_v57 }
 0x20b   :  { %1048 = vmatmul.mubr.msk.f32.gmra.mrb[22].mxu1 %vm615_vm3, %v591_v58 }
 0x20c   :  { %v1012_v59 = vpop.f32.mrb[8].mxu1 }
 0x20d   :  { %v551_v60 = vadd.f32 %v1012_v59, %v911_v34  ;;  %v545_v61 = vpop.f32.mrb[9].mxu1 }
 0x20e   :  { %v546_v62 = vadd.f32 %v911_v34, %v545_v61 }
 0x20f   :  { %v593_v0 = vmax.f32 %v551_v60, 0.0 }
 0x210   :  { %v592_v63 = vmax.f32 %v546_v62, 0.0 }
 0x212   :  { %1050 = vmatprep.mubr.msk.f32.mxu1 %vm615_vm3, %v592_v63 }
 0x213   :  { %1051 = vmatmul.mubr.msk.f32.gmra.mrb[24].mxu1 %vm615_vm3, %v593_v0 }
 0x214   :  { %v1015_v1 = vpop.f32.mrb[10].mxu1 }
 0x215   :  { %v561_v2 = vadd.f32 %v1015_v1, %v911_v34  ;;  %v555_v3 = vpop.f32.mrb[11].mxu1  ;;  %v945_v1 = vsel %vm843_vm4, 1.0, %v1208_v44 }
 0x216   :  { %v556_v4 = vadd.f32 %v911_v34, %v555_v3 }
 0x217   :  { %v595_v6 = vmax.f32 %v561_v2, 0.0 }
 0x218   :  { %v594_v5 = vmax.f32 %v556_v4, 0.0 }
 0x21a   :  { %1053 = vmatprep.mubr.msk.f32.mxu1 %vm615_vm3, %v594_v5 }
 0x21b   :  { %1054 = vmatmul.mubr.msk.f32.gmra.mrb[26].mxu1 %vm615_vm3, %v595_v6 }
 0x21c   :  { %v1018_v7 = vpop.f32.mrb[12].mxu1 }
 0x21d   :  { %v571_v8 = vadd.f32 %v1018_v7, %v911_v34  ;;  %v565_v9 = vpop.f32.mrb[13].mxu1 }
 0x21e   :  { %v566_v10 = vadd.f32 %v911_v34, %v565_v9 }
 0x21f   :  { %v597_v12 = vmax.f32 %v571_v8, 0.0 }
 0x220   :  { %v596_v11 = vmax.f32 %v566_v10, 0.0 }
 0x222   :  { %1056 = vmatprep.mubr.msk.f32.mxu1 %vm615_vm3, %v596_v11 }
 0x223   :  { %1057 = vmatmul.mubr.msk.f32.gmra.mrb[28].mxu1 %vm615_vm3, %v597_v12 }
 0x224   :  { %v1021_v13 = vpop.f32.mrb[14].mxu1 }
 0x225   :  { %v581_v14 = vadd.f32 %v1021_v13, %v911_v34  ;;  %v575_v15 = vpop.f32.mrb[15].mxu1  ;;  %v841_v13 = vld [vmem:[%s1598_s7] sm:$0x3f] }
 0x226   :  { %v576_v16 = vadd.f32 %v911_v34, %v575_v15 }
 0x227   :  { %v599_v18 = vmax.f32 %v581_v14, 0.0 }
 0x228   :  { %v598_v17 = vmax.f32 %v576_v16, 0.0 }
 0x22a   :  { %1059 = vmatprep.mubr.msk.f32.mxu1 %vm615_vm3, %v598_v17 }
 0x22b   :  { %1060 = vmatmul.mubr.msk.f32.gmra.mrb[30].mxu1 %vm615_vm3, %v599_v18 }
 0x2c6   :  { %v1040_v20 = vpop.f32.mrb[16].mxu1 }
 0x2c7   :  { %v730_v21 = vpop.f32.mrb[17].mxu1  ;;  %v736_v24 = vadd.f32 %v1040_v20, %v928_v19 }
 0x2c8   :  { %v731_v23 = vadd.f32 %v928_v19, %v730_v21 }
 0x2ca   :  { %809 = vxpose.xlu0.b32.start [1/16] (narrow) %v731_v23, 8 }
 0x2ce   :  { %v1043_v25 = vpop.f32.mrb[18].mxu1  ;;  %810 = vxpose.xlu0.b32.cont [2/16] (narrow) %v736_v24, 8 }
 0x2cf   :  { %v740_v26 = vpop.f32.mrb[19].mxu1  ;;  %v746_v28 = vadd.f32 %v1043_v25, %v928_v19 }
 0x2d0   :  { %v741_v27 = vadd.f32 %v928_v19, %v740_v26 }
 0x2d2   :  { %811 = vxpose.xlu0.b32.cont [3/16] (narrow) %v741_v27, 8 }
 0x2d6   :  { %v1046_v29 = vpop.f32.mrb[20].mxu1  ;;  %812 = vxpose.xlu0.b32.cont [4/16] (narrow) %v746_v28, 8 }
 0x2d7   :  { %v750_v30 = vpop.f32.mrb[21].mxu1  ;;  %v756_v32 = vadd.f32 %v1046_v29, %v928_v19 }
 0x2d8   :  { %v751_v31 = vadd.f32 %v928_v19, %v750_v30 }
 0x2da   :  { %813 = vxpose.xlu0.b32.cont [5/16] (narrow) %v751_v31, 8 }
 0x2de   :  { %v1049_v33 = vpop.f32.mrb[22].mxu1  ;;  %814 = vxpose.xlu0.b32.cont [6/16] (narrow) %v756_v32, 8 }
 0x2df   :  { %v760_v34 = vpop.f32.mrb[23].mxu1  ;;  %v766_v36 = vadd.f32 %v1049_v33, %v928_v19 }
 0x2e0   :  { %v761_v35 = vadd.f32 %v928_v19, %v760_v34 }
 0x2e2   :  { %815 = vxpose.xlu0.b32.cont [7/16] (narrow) %v761_v35, 8 }
 0x2e6   :  { %v1052_v37 = vpop.f32.mrb[24].mxu1  ;;  %816 = vxpose.xlu0.b32.cont [8/16] (narrow) %v766_v36, 8 }
 0x2e7   :  { %v770_v38 = vpop.f32.mrb[25].mxu1  ;;  %v776_v40 = vadd.f32 %v1052_v37, %v928_v19 }
 0x2e8   :  { %v771_v39 = vadd.f32 %v928_v19, %v770_v38 }
 0x2ea   :  { %817 = vxpose.xlu0.b32.cont [9/16] (narrow) %v771_v39, 8 }
 0x2ee   :  { %v1055_v22 = vpop.f32.mrb[26].mxu1  ;;  %818 = vxpose.xlu0.b32.cont [10/16] (narrow) %v776_v40, 8 }
 0x2ef   :  { %v780_v41 = vpop.f32.mrb[27].mxu1  ;;  %v786_v43 = vadd.f32 %v1055_v22, %v928_v19 }
 0x2f0   :  { %v781_v42 = vadd.f32 %v928_v19, %v780_v41 }
 0x2f2   :  { %819 = vxpose.xlu0.b32.cont [11/16] (narrow) %v781_v42, 8 }
 0x2f6   :  { %v1058_v45 = vpop.f32.mrb[28].mxu1  ;;  %820 = vxpose.xlu0.b32.cont [12/16] (narrow) %v786_v43, 8 }
 0x2f7   :  { %v790_v46 = vpop.f32.mrb[29].mxu1  ;;  %v796_v48 = vadd.f32 %v1058_v45, %v928_v19 }
 0x2f8   :  { %v791_v47 = vadd.f32 %v928_v19, %v790_v46 }
 0x2fa   :  { %821 = vxpose.xlu0.b32.cont [13/16] (narrow) %v791_v47, 8 }
 0x2fe   :  { %v1061_v49 = vpop.f32.mrb[30].mxu1  ;;  %822 = vxpose.xlu0.b32.cont [14/16] (narrow) %v796_v48, 8 }
 0x2ff   :  { %v800_v50 = vpop.f32.mrb[31].mxu1  ;;  %v806_v52 = vadd.f32 %v1061_v49, %v928_v19 }
 0x300   :  { %v801_v51 = vadd.f32 %v928_v19, %v800_v50 }
 0x302   :  { %823 = vxpose.xlu0.b32.cont [15/16] (narrow) %v801_v51, 8 }
 0x306   :  { %824 = vxpose.xlu0.b32.end [16/16] (narrow) %v806_v52, 8 }
 0x34a   :  { %v825_v54 = vpop.trf.xlu0 }
 0x34b   :  { %v846_v55 = vsel %vm843_vm4, %v825_v54, -1e+30 }
 0x34c   :  { %v848_v56 = vsel %vm847_vm5, %v846_v55, -inf }
 0x34d   :  { %v849_v57 = vrot.slane %v848_v56, 4 }
 0x34f   :  { %v850_v58 = vmax.f32 %v848_v56, %v849_v57 }
 0x351   :  { %v851_v59 = vrot.slane %v850_v58, 2 }
 0x353   :  { %v852_v60 = vmax.f32 %v850_v58, %v851_v59 }
 0x355   :  { %v853_v61 = vrot.slane %v852_v60, 1 }
 0x357   :  { %v854_v62 = vmax.f32 %v852_v60, %v853_v61 }
 0x359   :  { %v855_v63 = vsub.f32 %v846_v55, %v854_v62 }
 0x35b   :  { %v856_v0 = vmul.f32 1.442695, %v855_v63 }
 0x35d   :  { %1179 = vpow2.f32 %v856_v0 }
 0x367   :  { %v1180_v2 = vpop.eup %1179 }
 0x368   :  { %v858_v3 = vmul.f32 %v1180_v2, %v945_v1 }
 0x36a   :  { %v859_v4 = vsel %vm847_vm5, %v858_v3, 0.0 }
 0x36b   :  { %v860_v5 = vrot.slane %v859_v4, 4 }
 0x36d   :  { %v861_v6 = vadd.f32 %v860_v5, %v859_v4 }
 0x36f   :  { %v862_v7 = vrot.slane %v861_v6, 2 }
 0x371   :  { %v863_v8 = vadd.f32 %v862_v7, %v861_v6 }
 0x373   :  { %v864_v9 = vrot.slane %v863_v8, 1 }
 0x375   :  { %v865_v10 = vadd.f32 %v864_v9, %v863_v8 }
 0x377   :  { %vm866_vm6 = vcmp.eq.f32.partialorder %v865_v10, 0.0 }
 0x378   :  { %v867_v11 = vsel %vm866_vm6, 1.0, %v865_v10 }
 0x379   :  { %1181 = vrcp.f32 %v867_v11 }
 0x383   :  { %v1182_v12 = vpop.eup %1181 }
 0x384   :  { %v869_v14 = vmul.f32 %v1182_v12, %v858_v3 }
 0x386   :  { %v870_v44 = vmul.f32 %v869_v14, %v841_v13 }
 0x388   :  { %v871_v15 = vsel %vm847_vm5, %v870_v44, 0.0 }
 0x389   :  { %v872_v16 = vrot.slane %v871_v15, 4 }
 0x38b   :  { %v873_v17 = vadd.f32 %v872_v16, %v871_v15 }
 0x38d   :  { %v874_v18 = vrot.slane %v873_v17, 2 }
 0x38f   :  { %v875_v19 = vadd.f32 %v874_v18, %v873_v17 }
 0x391   :  { %v876_v20 = vrot.slane %v875_v19, 1 }
 0x393   :  { %v877_v21 = vadd.f32 %v876_v20, %v875_v19 }
 0x395   :  { %878 = vst [vmem:[#allocation2] sm:$0x1] %v877_v21 }
 0x396   :  { %1194 = shalt.err (!%p1191_p4)
}
 0x397   :  { %s1195_s11 = scalar_lea.hbm %s1600_s9, 16 }
 0x398   :  { %p1196_p5 = scmp.ne.s32.totalorder %s1600_s9, %s1195_s11  ;;  %p1199_p6 = scmp.lt.u32.totalorder %s1195_s11, %s1600_s9 }
 0x39a   :  { %p1201_p7 = pnand %p1199_p6, %p1196_p5 }
 0x39c   :  { %1204 = shalt.err (!%p1201_p7)
}
 0x39d   :  { %888 = dma.vmem_to_hbm [thread:$0]  %s886_s29, 16, %s1600_s9, [#allocation3]  }
 0x39e   :  { %1205 = dma.done.wait [#allocation3], 16  }
 0x39f   :  { %1206 = vsyncadd [#allocation3], 4294967280 }
 0x3a0   :  { %892 = vsyncpa [#allocation3], 1 }

</bundles_post_ra>
